<compile_context>
chip_gen: v5e
topology: v5e:2x2
jax: 0.10.0
libtpu: 0.0.40
codegen_flags: <defaults>
</compile_context>

<pallas_src>
import functools

import jax
import jax.numpy as jnp
from jax.experimental import pallas as pl
from jax.experimental.pallas import tpu as pltpu


# Sublane granularity per element size (packed-row tiling): f32->8, bf16->16,
# int8/fp8->32.
_SUBLANE_FOR_ITEMSIZE = {4: 8, 2: 16, 1: 32}

_LANE_WIDTH = 1024  # lane-dense slab width (multiple of 128 lanes)


def _silu_kernel_native(x_ref, o_ref):
    # y = x * sigmoid(x) computed in the input dtype (bf16 native on v6e/v7x).
    # exp -> EUP slot, mul -> VPU slot; kernel is HBM-bound either way.
    x = x_ref[...]
    o_ref[...] = (x * jax.nn.sigmoid(x)).astype(o_ref.dtype)


def _silu_kernel_f32(x_ref, o_ref):
    # f32-upcast variant for sub-f32 dtypes on chips without bf16 VPU/EUP (v5e).
    x = x_ref[...].astype(jnp.float32)
    o_ref[...] = (x * jax.nn.sigmoid(x)).astype(o_ref.dtype)


def _silu_jnp(x):
    # Plain-JAX path for tiny tensors / ragged tails (< _LANE_WIDTH elements):
    # a kernel launch costs more than the math there.
    return x * jax.nn.sigmoid(x)


@functools.lru_cache(maxsize=1)
def _tpu_config():
    """Per-generation (block_bytes, vmem_limit_bytes_or_None, native_bf16)."""
    try:
        kind = jax.devices()[0].device_kind.lower()
    except Exception:  # pragma: no cover - defensive
        kind = ""
    is_v5e = ("v5 lite" in kind) or ("v5e" in kind) or ("v5lite" in kind)
    if is_v5e:
        # 16 MiB scoped-VMEM default: 2 MiB blocks, double-buffered in+out = 8 MiB.
        return 2 * 1024 * 1024, None, False
    if "v7" in kind:
        # ~1.6 TB/s per-TC HBM: use 8 MiB blocks; 2 bufs x (in+out) = 32 MiB
        # resident, so raise the scoped-VMEM limit explicitly (64 MiB physical).
        return 8 * 1024 * 1024, 48 * 1024 * 1024, True
    if "v6" in kind:
        # 4 MiB blocks -> 16 MiB resident, fits the 32 MiB scoped default.
        return 4 * 1024 * 1024, None, True
    # Unknown / older generations: conservative sizing, f32 compute for bf16.
    return 2 * 1024 * 1024, None, False


def _silu_pallas_2d(x2d):
    """Runs the SiLU kernel over a lane-dense (rows, _LANE_WIDTH) slab."""
    rows, lane_width = x2d.shape
    assert lane_width % 128 == 0
    dtype = x2d.dtype
    itemsize = jnp.dtype(dtype).itemsize
    sublane = _SUBLANE_FOR_ITEMSIZE.get(itemsize, 8)

    block_bytes, vmem_limit, native_bf16 = _tpu_config()

    # Block rows: close to the generation's target block size, sublane-aligned.
    target_rows = max(sublane, block_bytes // (lane_width * itemsize))
    tile_rows = min(target_rows, rows)
    # Keep >= 2 grid steps whenever there are >= 2 sublane tiles of rows, so
    # v7x can shard the "parallel" axis across both TensorCores.
    if rows >= 2 * sublane:
        half_rows = max(sublane, (pl.cdiv(rows, 2) // sublane) * sublane)
        tile_rows = min(tile_rows, half_rows)
    tile_rows = max(sublane, (tile_rows // sublane) * sublane)

    grid = (pl.cdiv(rows, tile_rows),)  # ragged last block: writes are masked

    if dtype == jnp.float32 or (dtype == jnp.bfloat16 and native_bf16):
        kernel = _silu_kernel_native
    else:
        kernel = _silu_kernel_f32

    params = dict(dimension_semantics=("parallel",))
    if vmem_limit is not None:
        params["vmem_limit_bytes"] = vmem_limit

    n_elems = rows * lane_width
    return pl.pallas_call(
        kernel,
        out_shape=jax.ShapeDtypeStruct((rows, lane_width), dtype),
        grid=grid,
        in_specs=[pl.BlockSpec((tile_rows, lane_width), lambda i: (i, 0))],
        out_specs=pl.BlockSpec((tile_rows, lane_width), lambda i: (i, 0)),
        compiler_params=pltpu.CompilerParams(**params),
        cost_estimate=pl.CostEstimate(
            flops=4 * n_elems,
            transcendentals=n_elems,
            bytes_accessed=2 * n_elems * itemsize,
        ),
    )(x2d)


def lambda_forward(x):
    """Applies Lambda(lambda x: x * sigmoid(x)) via a Pallas TPU kernel.

    Works for any shape: lane-aligned sizes reshape to a (rows, 1024) slab for
    free (no pad, no slice); ragged sizes run the aligned bulk through the
    kernel and the <1024-element tail through plain JAX.
    """
    orig_shape = x.shape
    n = x.size
    if n == 0:
        return x

    flat = x.reshape(-1)  # free (row-major bitcast)
    bulk_rows = n // _LANE_WIDTH
    bulk_elems = bulk_rows * _LANE_WIDTH
    tail_elems = n - bulk_elems

    if bulk_rows == 0:
        # Tiny tensor (< 1024 elements): not worth a kernel launch.
        return _silu_jnp(x)

    if tail_elems == 0:
        # Fast path: zero-copy reshape, zero-copy reshape back.  Non-multiple-
        # of-sublane row counts are handled by Pallas' masked ragged last block.
        out2d = _silu_pallas_2d(flat.reshape(bulk_rows, _LANE_WIDTH))
        return out2d.reshape(orig_shape)

    # Ragged path: aligned bulk through the kernel, tiny tail in plain JAX.
    bulk = flat[:bulk_elems].reshape(bulk_rows, _LANE_WIDTH)
    tail = flat[bulk_elems:]
    out_bulk = _silu_pallas_2d(bulk).reshape(-1)
    out_tail = _silu_jnp(tail)
    # TODO(synk): the concatenate is one residual HBM pass over the bulk on
    # ragged sizes; fully eliminating it requires fusing this op into its
    # producer (or lane-aligned activation sizes upstream).
    return jnp.concatenate([out_bulk, out_tail]).reshape(orig_shape)


if __name__ == "__main__":
    key = jax.random.PRNGKey(0)

    # Small NCHW activation: batch=2, channels=4, spatial=16x16 (2048 elems,
    # lane-aligned -> zero-copy fast path).
    x = jax.random.normal(key, (2, 4, 16, 16), dtype=jnp.float32)
    y = lambda_forward(x)
    jax.block_until_ready(y)
    y_ref = x * jax.nn.sigmoid(x)
    assert y.shape == x.shape and y.dtype == x.dtype
    assert jnp.allclose(y, y_ref, atol=1e-6, rtol=1e-6)

    # Slightly larger aligned shape: exercises the >=2-grid-step split
    # (16384 elems -> 16 rows -> 2 grid steps).
    x1 = jax.random.normal(jax.random.PRNGKey(2), (2, 8, 32, 32), dtype=jnp.float32)
    y1 = lambda_forward(x1)
    jax.block_until_ready(y1)
    assert jnp.allclose(y1, x1 * jax.nn.sigmoid(x1), atol=1e-6, rtol=1e-6)

    # Awkward ragged shape: exercises the bulk + tail split (no pad/slice).
    x2 = jax.random.normal(jax.random.PRNGKey(1), (3, 5, 7, 11), dtype=jnp.float32)
    y2 = lambda_forward(x2)
    jax.block_until_ready(y2)
    assert y2.shape == x2.shape and y2.dtype == x2.dtype
    assert jnp.allclose(y2, x2 * jax.nn.sigmoid(x2), atol=1e-6, rtol=1e-6)

    print("KERNEL_OK")
</pallas_src>

<mosaic_0001>
module attributes {stable_mosaic.version = 11 : i64} {
  func.func @_silu_kernel_native(%arg0: i32, %arg1: memref<8x1024xf32, #tpu.memory_space<vmem>>, %arg2: memref<8x1024xf32, #tpu.memory_space<vmem>>) attributes {dimension_semantics = [#tpu.dimension_semantics<parallel>], iteration_bounds = array<i64: 1>, scalar_prefetch = 0 : i64, scratch_operands = 0 : i64, tpu.core_type = #tpu.core_type<tc>, window_params = [{transform_indices = @transform_0, window_bounds = array<i64: 8, 1024>}, {transform_indices = @transform_1, window_bounds = array<i64: 8, 1024>}]} {
    %c0 = arith.constant 0 : index
    %c0_0 = arith.constant 0 : index
    %0 = vector.load %arg1[%c0, %c0_0] : memref<8x1024xf32, #tpu.memory_space<vmem>>, vector<8x1024xf32>
    %1 = arith.negf %0 : vector<8x1024xf32>
    %2 = math.exp %1 : vector<8x1024xf32>
    %cst = arith.constant 1.000000e+00 : f32
    %3 = vector.broadcast %cst : f32 to vector<8x1024xf32>
    %4 = arith.addf %3, %2 : vector<8x1024xf32>
    %5 = arith.divf %3, %4 : vector<8x1024xf32>
    %6 = arith.mulf %0, %5 : vector<8x1024xf32>
    %c0_1 = arith.constant 0 : index
    %c0_2 = arith.constant 0 : index
    %7 = vector.load %arg2[%c0_1, %c0_2] : memref<8x1024xf32, #tpu.memory_space<vmem>>, vector<8x1024xf32>
    tpu.vector_store %arg2[%c0_1, %c0_2], %6 {strides = array<i32>} : memref<8x1024xf32, #tpu.memory_space<vmem>>, vector<8x1024xf32>,
    return
  }
  func.func @transform_0(%arg0: i32) -> (i32, i32) {
    %c0_i32 = arith.constant 0 : i32
    %c0_i32_0 = arith.constant 0 : i32
    return %arg0, %c0_i32 : i32, i32
  }
  func.func @transform_1(%arg0: i32) -> (i32, i32) {
    %c0_i32 = arith.constant 0 : i32
    %c0_i32_0 = arith.constant 0 : i32
    return %arg0, %c0_i32 : i32, i32
  }
}

</mosaic_0001>

<bundles_post_ra>
// kernel: tpu_custom_call.1
= control target key start
LH: loop header
LB: loop body
LE: loop exit
PB: predicated region body
PF: predicated region fallthrough
CT: control target
= control target key end

     0   :  { %6 = vsyncpa [#allocation3], 0  ;;  %s484_s0 = inlined_call_operand.hbm [shape: f32[2,1024], index: 0, kind: input, shape index: {}]   ;;  %s485_s1 = inlined_call_operand.hbm [shape: f32[2,1024], index: 1, kind: output, shape index: {}]  }
   0x1   :  { %7 = vsyncpa [#allocation4], 0 }
   0x2   :  { %11 = vsyncadd [#allocation3], 768  ;;  %s12_s8 = sshll.u32 %s484_s0, 4  ;;  %s316_s9 = smov [#allocation2]   ;;  %s13_s8 = int_to_ptr.hbm [resolvable:$true] %s12_s8 }
   0x3   :  { %s14_s10 = sshll.u32 %s316_s9, 4  ;;  %s317_s11 = smov 256   ;;  %s15_s10 = int_to_ptr.vmem [resolvable:$true] %s14_s10 }
   0x4   :  { %s318_s12 = smov 16  }
   0x5   :  { %20 = dma.hbm_to_vmem [thread:$0]  %s13_s8, 256, %s15_s10, [#allocation3], %s317_s11, %s317_s11, %s318_s12  }
   0x6   :  { %312 = dma.done.wait [#allocation3], 1024  }
   0x7   :  { %313 = vsyncadd [#allocation3], 4294966272  ;;  %v336_v0 = vld [vmem:[#allocation2] sm:$0xff]  ;;  %v338_v1 = vld [vmem:[#allocation2 + $0x8] sm:$0xff] }
   0x8   :  { %v340_v2 = vld [vmem:[#allocation2 + $0x10] sm:$0xff]  ;;  %v220_v3 = vmul.f32 -1.442695, %v336_v0  ;;  %v221_v4 = vmul.f32 -1.442695, %v338_v1  ;;  %v345_v6 = vld [vmem:[#allocation2 + $0x18] sm:$0xff] }
   0x9   :  { %v222_v5 = vmul.f32 -1.442695, %v340_v2  ;;  %v347_v7 = vld [vmem:[#allocation2 + $0x20] sm:$0xff]  ;;  %v349_v8 = vld [vmem:[#allocation2 + $0x28] sm:$0xff]  ;;  %v223_v9 = vmul.f32 -1.442695, %v345_v6 }
   0xa   :  { %232 = vpow2.f32 %v220_v3  ;;  %v224_v10 = vmul.f32 -1.442695, %v347_v7  ;;  %v225_v11 = vmul.f32 -1.442695, %v349_v8  ;;  %v354_v12 = vld [vmem:[#allocation2 + $0x30] sm:$0xff]  ;;  %v356_v13 = vld [vmem:[#allocation2 + $0x38] sm:$0xff] }
   0xb   :  { %234 = vpow2.f32 %v221_v4  ;;  %v226_v17 = vmul.f32 -1.442695, %v354_v12  ;;  %v227_v20 = vmul.f32 -1.442695, %v356_v13 }
   0xc   :  { %236 = vpow2.f32 %v222_v5 }
   0xd   :  { %238 = vpow2.f32 %v223_v9 }
   0xe   :  { %240 = vpow2.f32 %v224_v10 }
   0xf   :  { %242 = vpow2.f32 %v225_v11 }
  0x10   :  { %v233_v14 = vpop.eup %232 }
  0x11   :  { %v235_v15 = vpop.eup %234  ;;  %v57_v16 = vadd.f32 1.0, %v233_v14 }
  0x12   :  { %v237_v18 = vpop.eup %236  ;;  %v359_v19 = vadd.f32 1.0, %v235_v15 }
  0x13   :  { %v239_v21 = vpop.eup %238  ;;  %244 = vrcp.f32 %v57_v16  ;;  %v74_v23 = vand.u32 2147483647, %v57_v16  ;;  %v76_v24 = vand.u32 2147483648, %v57_v16  ;;  %v364_v27 = vadd.f32 1.0, %v237_v18 }
  0x14   :  { %v241_v22 = vpop.eup %240  ;;  %246 = vrcp.f32 %v359_v19  ;;  %v89_v26 = vand.u32 2147483647, %v359_v19  ;;  %v366_v28 = vadd.f32 1.0, %v239_v21  ;;  %v91_v29 = vand.u32 2147483648, %v359_v19 }
  0x15   :  { %v243_v25 = vpop.eup %242  ;;  %248 = vpow2.f32 %v226_v17  ;;  %v369_v30 = vadd.f32 1.0, %v241_v22  ;;  %vm70_vm0 = vweird.f32 %v57_v16  ;;  %vm85_vm1 = vweird.f32 %v359_v19 }
  0x16   :  { %250 = vpow2.f32 %v227_v20  ;;  %v106_v31 = vand.u32 2147483648, %v364_v27  ;;  %vm374_vm2 = vcmp.eq.f32.partialorder %v74_v23, 8.507059e+37  ;;  %v77_v33 = vor.u32 1.1754944e-38, %v76_v24 }
  0x17   :  { %252 = vrcp.f32 %v364_v27  ;;  %v104_v34 = vand.u32 2147483647, %v364_v27  ;;  %v380_v35 = vadd.f32 1.0, %v243_v25  ;;  %vm382_vm3 = vcmp.eq.f32.partialorder %v89_v26, 8.507059e+37 }
  0x18   :  { %254 = vrcp.f32 %v366_v28  ;;  %v119_v38 = vand.u32 2147483647, %v366_v28  ;;  %v121_v39 = vand.u32 2147483648, %v366_v28  ;;  %v92_v42 = vor.u32 1.1754944e-38, %v91_v29 }
  0x19   :  { %v245_v36 = vpop.eup %244  ;;  %256 = vrcp.f32 %v369_v30  ;;  %vm100_vm4 = vweird.f32 %v364_v27  ;;  %vm115_vm5 = vweird.f32 %v366_v28  ;;  %v107_v45 = vor.u32 1.1754944e-38, %v106_v31 }
  0x1a   :  { %v247_v40 = vpop.eup %246  ;;  %v66_v41 = vmul.f32 %v245_v36, %v57_v16  ;;  %v134_v46 = vand.u32 2147483647, %v369_v30  ;;  %v136_v47 = vand.u32 2147483648, %v369_v30  ;;  %vm71_vm6 = vweird.f32 %v245_v36 }
  0x1b   :  { %v249_v43 = vpop.eup %248  ;;  %v81_v44 = vmul.f32 %v247_v40, %v359_v19  ;;  %vm394_vm7 = vcmp.eq.f32.partialorder %v104_v34, 8.507059e+37  ;;  %vm130_vm8 = vweird.f32 %v369_v30  ;;  %258 = vrcp.f32 %v380_v35  ;;  %vm413_vm13 = vmor %vm70_vm0, %vm71_vm6 }
  0x1c   :  { %v251_v48 = vpop.eup %250  ;;  %v67_v49 = vsub.f32 1.0, %v66_v41  ;;  %vm86_vm9 = vweird.f32 %v247_v40  ;;  %vm400_vm10 = vcmp.eq.f32.partialorder %v119_v38, 8.507059e+37  ;;  %v122_v54 = vor.u32 1.1754944e-38, %v121_v39 }
  0x1d   :  { %v253_v51 = vpop.eup %252  ;;  %v82_v52 = vsub.f32 1.0, %v81_v44  ;;  %vm145_vm11 = vweird.f32 %v380_v35  ;;  %vm406_vm12 = vcmp.eq.f32.partialorder %v134_v46, 8.507059e+37  ;;  %v149_v59 = vand.u32 2147483647, %v380_v35  ;;  %vm422_vm14 = vmor %vm85_vm1, %vm86_vm9 }
  0x1e   :  { %v255_v55 = vpop.eup %254  ;;  %v68_v56 = vmul.f32 %v245_v36, %v67_v49  ;;  %v96_v57 = vmul.f32 %v253_v51, %v364_v27  ;;  %v137_v3 = vor.u32 1.1754944e-38, %v136_v47  ;;  %v151_v4 = vand.u32 2147483648, %v380_v35 }
  0x1f   :  { %v257_v60 = vpop.eup %256  ;;  %v83_v62 = vmul.f32 %v247_v40, %v82_v52  ;;  %v111_v63 = vmul.f32 %v255_v55, %v366_v28  ;;  %vm101_vm15 = vweird.f32 %v253_v51  ;;  %vm116_vm0 = vweird.f32 %v255_v55 }
  0x20   :  { %v69_v5 = vadd.f32 %v245_v36, %v68_v56  ;;  %v97_v10 = vsub.f32 1.0, %v96_v57  ;;  %v126_v11 = vmul.f32 %v257_v60, %v369_v30  ;;  %vm131_vm6 = vweird.f32 %v257_v60  ;;  %vm435_vm1 = vmor %vm100_vm4, %vm101_vm15 }
  0x21   :  { %v84_v14 = vadd.f32 %v247_v40, %v83_v62  ;;  %v112_v15 = vsub.f32 1.0, %v111_v63  ;;  %v259_v16 = vpop.eup %258  ;;  %v63_v21 = vadd.f32 1.0, %v249_v43  ;;  %vm454_vm4 = vmor %vm130_vm8, %vm131_vm6  ;;  %v64_v38 = vadd.f32 1.0, %v251_v48 }
  0x22   :  { %v73_v17 = vsel %vm413_vm13, %v245_v36, %v69_v5  ;;  %v98_v18 = vmul.f32 %v253_v51, %v97_v10  ;;  %v127_v20 = vsub.f32 1.0, %v126_v11  ;;  %v141_v25 = vmul.f32 %v259_v16, %v380_v35 }
  0x23   :  { %v78_v19 = vsel %vm374_vm2, %v77_v33, %v73_v17  ;;  %v88_v22 = vsel %vm422_vm14, %v247_v40, %v84_v14  ;;  %v113_v24 = vmul.f32 %v255_v55, %v112_v15  ;;  %vm446_vm2 = vmor %vm115_vm5, %vm116_vm0  ;;  %260 = vrcp.f32 %v63_v21 }
  0x24   :  { %v185_v26 = vmul.f32 %v78_v19, %v336_v0  ;;  %v93_v29 = vsel %vm382_vm3, %v92_v42, %v88_v22  ;;  %v99_v31 = vadd.f32 %v253_v51, %v98_v18  ;;  %v128_v27 = vmul.f32 %v257_v60, %v127_v20 }
  0x25   :  { %v186_v33 = vmul.f32 %v93_v29, %v338_v1  ;;  %v114_v34 = vadd.f32 %v255_v55, %v113_v24  ;;  %v142_v36 = vsub.f32 1.0, %v141_v25  ;;  %vm146_vm3 = vweird.f32 %v259_v16 }
  0x26   :  { %193 = vst [vmem:[#allocation5] sm:$0xff] %v185_v26  ;;  %v103_v28 = vsel %vm435_vm1, %v253_v51, %v99_v31  ;;  %v129_v37 = vadd.f32 %v257_v60, %v128_v27  ;;  %vm147_vm5 = vmor %vm145_vm11, %vm146_vm3  ;;  %v152_v43 = vor.u32 1.1754944e-38, %v151_v4  ;;  %262 = vrcp.f32 %v64_v38 }
  0x27   :  { %194 = vst [vmem:[#allocation5 + $0x8] sm:$0xff] %v186_v33  ;;  %v108_v1 = vsel %vm394_vm7, %v107_v45, %v103_v28  ;;  %v118_v30 = vsel %vm446_vm2, %v255_v55, %v114_v34  ;;  %v143_v39 = vmul.f32 %v259_v16, %v142_v36  ;;  %vm150_vm7 = vcmp.eq.f32.partialorder %v149_v59, 8.507059e+37 }
  0x28   :  { %v187_v40 = vmul.f32 %v108_v1, %v340_v2  ;;  %v123_v41 = vsel %vm400_vm10, %v122_v54, %v118_v30  ;;  %v133_v42 = vsel %vm454_vm4, %v257_v60, %v129_v37  ;;  %v164_v51 = vand.u32 2147483647, %v63_v21 }
  0x29   :  { %v188_v44 = vmul.f32 %v123_v41, %v345_v6  ;;  %v138_v45 = vsel %vm406_vm12, %v137_v3, %v133_v42  ;;  %v144_v46 = vadd.f32 %v259_v16, %v143_v39  ;;  %v261_v48 = vpop.eup %260  ;;  %v166_v52 = vand.u32 2147483648, %v63_v21 }
  0x2a   :  { %195 = vst [vmem:[#allocation5 + $0x10] sm:$0xff] %v187_v40  ;;  %v189_v2 = vmul.f32 %v138_v45, %v347_v7  ;;  %v156_v50 = vmul.f32 %v261_v48, %v63_v21  ;;  %vm160_vm8 = vweird.f32 %v63_v21  ;;  %vm161_vm9 = vweird.f32 %v261_v48 }
  0x2b   :  { %196 = vst [vmem:[#allocation5 + $0x18] sm:$0xff] %v188_v44  ;;  %v148_v47 = vsel %vm147_vm5, %v259_v16, %v144_v46  ;;  %vm162_vm10 = vmor %vm160_vm8, %vm161_vm9  ;;  %vm165_vm11 = vcmp.eq.f32.partialorder %v164_v51, 8.507059e+37  ;;  %v167_v7 = vor.u32 1.1754944e-38, %v166_v52  ;;  %vm175_vm12 = vweird.f32 %v64_v38 }
  0x2c   :  { %197 = vst [vmem:[#allocation5 + $0x20] sm:$0xff] %v189_v2  ;;  %v153_v49 = vsel %vm150_vm7, %v152_v43, %v148_v47  ;;  %v157_v6 = vsub.f32 1.0, %v156_v50  ;;  %v263_v53 = vpop.eup %262  ;;  %v181_v56 = vand.u32 2147483648, %v64_v38  ;;  %v179_v59 = vand.u32 2147483647, %v64_v38 }
  0x2d   :  { %v190_v35 = vmul.f32 %v153_v49, %v349_v8  ;;  %v171_v55 = vmul.f32 %v263_v53, %v64_v38  ;;  %vm176_vm13 = vweird.f32 %v263_v53 }
  0x2e   :  { %v158_v54 = vmul.f32 %v261_v48, %v157_v6  ;;  %vm177_vm14 = vmor %vm175_vm12, %vm176_vm13  ;;  %v182_v62 = vor.u32 1.1754944e-38, %v181_v56  ;;  %vm180_vm15 = vcmp.eq.f32.partialorder %v179_v59, 8.507059e+37 }
  0x2f   :  { %198 = vst [vmem:[#allocation5 + $0x28] sm:$0xff] %v190_v35  ;;  %v172_v58 = vsub.f32 1.0, %v171_v55 }
  0x30   :  { %v159_v57 = vadd.f32 %v261_v48, %v158_v54 }
  0x31   :  { %v173_v60 = vmul.f32 %v263_v53, %v172_v58 }
  0x32   :  { %v163_v8 = vsel %vm162_vm10, %v261_v48, %v159_v57 }
  0x33   :  { %v168_v61 = vsel %vm165_vm11, %v167_v7, %v163_v8  ;;  %v174_v3 = vadd.f32 %v263_v53, %v173_v60 }
  0x34   :  { %v191_v63 = vmul.f32 %v168_v61, %v354_v12 }
  0x35   :  { %v178_v4 = vsel %vm177_vm14, %v263_v53, %v174_v3 }
  0x36   :  { %199 = vst [vmem:[#allocation5 + $0x30] sm:$0xff] %v191_v63  ;;  %v183_v5 = vsel %vm180_vm15, %v182_v62, %v178_v4 }
  0x37   :  { %v192_v9 = vmul.f32 %v183_v5, %v356_v13 }
  0x39   :  { %200 = vst [vmem:[#allocation5 + $0x38] sm:$0xff] %v192_v9 }
  0x3a   :  { %204 = vsyncadd [#allocation4], 768  ;;  %s207_s14 = sshll.u32 %s485_s1, 4  ;;  %s319_s15 = smov [#allocation5]   ;;  %s208_s14 = int_to_ptr.hbm [resolvable:$true] %s207_s14 }
  0x3b   :  { %s205_s16 = sshll.u32 %s319_s15, 4  ;;  %s206_s16 = int_to_ptr.vmem [resolvable:$true] %s205_s16 }
  0x3c   :  { %213 = dma.vmem_to_hbm [thread:$0]  %s206_s16, 256, %s208_s14, [#allocation4], %s317_s11, %s317_s11, %s318_s12  }
  0x3d   :  { %314 = dma.done.wait [#allocation4], 1024  }
  0x3e   :  { %315 = vsyncadd [#allocation4], 4294966272 }
  0x3f   :  { %218 = vsyncpa [#allocation3], 1 }
  0x40   :  { %219 = vsyncpa [#allocation4], 1 }

</bundles_post_ra>
